<compile_context>
chip_gen: v7x
topology: tpu7x:2x2x1
jax: 0.10.0
libtpu: 0.0.40
codegen_flags: <defaults>
</compile_context>

<pallas_src>
import math

import jax
import jax.numpy as jnp
from jax.experimental import pallas as pl
from jax.experimental.pallas import tpu as pltpu


def _preproc_kernel(item_ref, ratings_ref, ids_ref, pos_ref, remb_ref, ue_ref):
    bb, bn, item_dim = item_ref.shape        # full batch folded into the block
    R, rate_dim = remb_ref.shape             # tiny resident rating table
    D = item_dim + rate_dim
    scale = jnp.float32(math.sqrt(float(D)))

    item = item_ref[...].astype(jnp.float32)      # (bb, bn, item_dim)
    ratings = ratings_ref[...]                    # (bb, bn, 1) int32
    valid = ids_ref[...] != 0                     # (bb, bn, 1) bool
    pos = pos_ref[...].astype(jnp.float32)        # (bn, D)
    remb = remb_ref[...]                          # (R, rate_dim) f32, * sqrt(D)

    # Rating-embedding "gather": num_ratings is tiny, so unroll a VPU
    # select-accumulate over the resident table rows (a one-hot MXU matmul
    # would pad R to 128 lanes and run at <1% MXU efficiency).
    # TODO(synk): for very large num_ratings switch to a DMA/SMEM-indexed gather.
    rate_vec = jnp.zeros((bb, bn, rate_dim), jnp.float32)
    for r in range(R):
        row = remb[r:r + 1, :].reshape(1, 1, rate_dim)   # already scaled
        rate_vec = rate_vec + jnp.where(ratings == r, row, 0.0)

    # concat([item_emb, rating_emb(ratings)], -1) * sqrt(D) + pos_emb[n]
    # (rate_vec is pre-scaled; the lane-axis concat is VMEM-local work that is
    #  hidden behind the HBM-bound output stream.)
    ue = jnp.concatenate([item * scale, rate_vec], axis=-1) + pos[None]

    # TODO(synk): training-mode dropout omitted (eval/inference semantics);
    # parity would need pltpu.prng_seed / pltpu.prng_random_bits.

    ue_ref[...] = jnp.where(valid, ue, 0.0).astype(ue_ref.dtype)


def _round_up(x: int, m: int) -> int:
    return ((x + m - 1) // m) * m


def _pick_block_n(N, B, item_dim, D, item_bytes, out_bytes, budget_bytes):
    """Largest seq-tile whose double-buffered working set fits the VMEM budget."""
    # Per-token bytes of one grid step (item + ids + ratings + out across the
    # whole batch, plus the batch-independent pos rows), x2 for double buffering.
    per_token = 2 * (B * (item_dim * item_bytes + 4 + 4 + D * out_bytes) + 4 * D)
    bn = max(8, budget_bytes // max(per_token, 1))
    # Keep >= 2 seq blocks when N is large so both v7x TensorCores get work.
    if N >= 2048:
        bn = min(bn, max(1024, _round_up(pl.cdiv(N, 2), 8)))
    bn = min(bn, _round_up(N, 8))     # never (much) larger than the sequence
    return max(8, (bn // 8) * 8)      # multiple of 8 (f32 sublane tile)


def preprocess(past_lengths, past_ids, past_embeddings, ratings,
               pos_emb, rating_emb, *, out_dtype=None,
               block_budget_bytes=20 * 1024 * 1024):
    """JAX wrapper matching the PyTorch forward() semantics (eval mode)."""
    B, N = past_ids.shape
    item_dim = past_embeddings.shape[-1]
    R, rate_dim = rating_emb.shape
    D = item_dim + rate_dim
    assert pos_emb.shape[-1] == D and pos_emb.shape[0] >= N

    if out_dtype is None:
        # NOTE: pass out_dtype=jnp.bfloat16 on v6e/v7x (if tolerance allows) to
        # halve the dominant HBM write stream.
        out_dtype = jnp.promote_types(past_embeddings.dtype, pos_emb.dtype)

    item_b = jnp.dtype(past_embeddings.dtype).itemsize
    pos_b = jnp.dtype(pos_emb.dtype).itemsize
    out_b = jnp.dtype(out_dtype).itemsize

    bn = _pick_block_n(N, B, item_dim, D, item_b, out_b, block_budget_bytes)
    nb = pl.cdiv(N, bn)   # ragged tail handled by Pallas (OOB writes dropped)

    # Metadata-only reshapes: trailing unit dim puts tokens on sublanes so the
    # in-kernel rating/mask broadcasts are cheap lane broadcasts.
    ratings3 = ratings.astype(jnp.int32).reshape(B, N, 1)
    ids3 = past_ids.astype(jnp.int32).reshape(B, N, 1)

    # Tiny, grid-invariant table: pre-cast + pre-scale by sqrt(D) once in XLA.
    remb_scaled = rating_emb.astype(jnp.float32) * math.sqrt(float(D))

    bytes_accessed = (B * N * item_dim * item_b     # item embeddings (read)
                      + 2 * B * N * 4               # ratings + ids (read)
                      + N * D * pos_b               # pos table (read once)
                      + R * rate_dim * 4            # rating table (read once)
                      + B * N * D * out_b)          # user_embeddings (write)
    flops = B * N * (item_dim + 2 * D + 2 * R * rate_dim)

    ue = pl.pallas_call(
        _preproc_kernel,
        grid=(nb,),
        in_specs=[
            pl.BlockSpec((B, bn, item_dim), lambda n: (0, n, 0)),
            pl.BlockSpec((B, bn, 1), lambda n: (0, n, 0)),
            pl.BlockSpec((B, bn, 1), lambda n: (0, n, 0)),
            # Full pos table passed; index map restricts reads to rows < ~N.
            pl.BlockSpec((bn, D), lambda n: (n, 0)),
            pl.BlockSpec((R, rate_dim), lambda n: (0, 0)),
        ],
        out_specs=pl.BlockSpec((B, bn, D), lambda n: (0, n, 0)),
        out_shape=jax.ShapeDtypeStruct((B, N, D), out_dtype),
        compiler_params=pltpu.CompilerParams(
            dimension_semantics=("parallel",),
            vmem_limit_bytes=32 * 1024 * 1024),
        cost_estimate=pl.CostEstimate(
            flops=flops, transcendentals=0, bytes_accessed=bytes_accessed),
    )(past_embeddings, ratings3, ids3, pos_emb, remb_scaled)

    # valid_mask is trivially cheap for XLA to produce fused outside the kernel
    # (a (B, N, 1) kernel output would force lane-sparse vst.msk stores).
    valid_mask = (past_ids != 0).astype(jnp.float32)[:, :, None]
    return past_lengths, ue, valid_mask


def _reference(past_lengths, past_ids, past_embeddings, ratings,
               pos_emb, rating_emb):
    B, N = past_ids.shape
    D = pos_emb.shape[-1]
    remb = rating_emb[ratings]                               # (B, N, rate_dim)
    ue = jnp.concatenate(
        [past_embeddings.astype(jnp.float32), remb.astype(jnp.float32)],
        axis=-1) * math.sqrt(D)
    ue = ue + pos_emb[:N][None, :, :].astype(jnp.float32)
    mask = (past_ids != 0).astype(jnp.float32)[..., None]
    return past_lengths, ue * mask, mask


def _run_case(key, B, N, max_seq_len, item_dim, rate_dim, num_ratings,
              block_budget_bytes=20 * 1024 * 1024):
    D = item_dim + rate_dim
    k_pos, k_rat, k_emb, k_ids, k_rtg = jax.random.split(key, 5)
    std = math.sqrt(1.0 / D)
    pos_emb = std * jax.random.truncated_normal(
        k_pos, -2.0, 2.0, (max_seq_len, D), jnp.float32)
    rating_emb = std * jax.random.truncated_normal(
        k_rat, -2.0, 2.0, (num_ratings, rate_dim), jnp.float32)
    past_embeddings = jax.random.normal(k_emb, (B, N, item_dim), jnp.float32)
    past_ids = jax.random.randint(k_ids, (B, N), 0, 100, jnp.int32)
    past_ids = past_ids.at[0, -2:].set(0)   # some padding positions
    ratings = jax.random.randint(k_rtg, (B, N), 0, num_ratings, jnp.int32)
    past_lengths = jnp.full((B,), N, dtype=jnp.int32)

    lengths_out, ue_out, mask_out = preprocess(
        past_lengths, past_ids, past_embeddings, ratings, pos_emb, rating_emb,
        block_budget_bytes=block_budget_bytes)
    jax.block_until_ready((lengths_out, ue_out, mask_out))

    _, ue_ref, mask_ref = _reference(
        past_lengths, past_ids, past_embeddings, ratings, pos_emb, rating_emb)
    assert ue_out.shape == (B, N, D)
    assert mask_out.shape == (B, N, 1)
    assert jnp.allclose(ue_out.astype(jnp.float32), ue_ref, atol=1e-5, rtol=1e-5)
    assert jnp.allclose(mask_out, mask_ref)


if __name__ == "__main__":
    key = jax.random.PRNGKey(0)
    k1, k2, k3 = jax.random.split(key, 3)

    # Small config consistent with the module (B=2, seq=8, D=24+8=32).
    _run_case(k1, B=2, N=8, max_seq_len=8,
              item_dim=24, rate_dim=8, num_ratings=5)

    # Larger sequence, pos table longer than N (unsliced-table path), one
    # whole-batch block.
    _run_case(k2, B=3, N=1024, max_seq_len=1280,
              item_dim=24, rate_dim=8, num_ratings=5)

    # Force a multi-block grid with a ragged cdiv tail (tiny VMEM budget).
    _run_case(k3, B=2, N=640, max_seq_len=768,
              item_dim=24, rate_dim=8, num_ratings=5,
              block_budget_bytes=320 * 1024)

    print("KERNEL_OK")
</pallas_src>

<mosaic_0001>
module attributes {stable_mosaic.version = 11 : i64} {
  func.func @_preproc_kernel(%arg0: i32, %arg1: memref<2x8x24xf32, #tpu.memory_space<vmem>>, %arg2: memref<2x8x1xi32, #tpu.memory_space<vmem>>, %arg3: memref<2x8x1xi32, #tpu.memory_space<vmem>>, %arg4: memref<8x32xf32, #tpu.memory_space<vmem>>, %arg5: memref<5x8xf32, #tpu.memory_space<vmem>>, %arg6: memref<2x8x32xf32, #tpu.memory_space<vmem>>) attributes {dimension_semantics = [#tpu.dimension_semantics<parallel>], iteration_bounds = array<i64: 1>, scalar_prefetch = 0 : i64, scratch_operands = 0 : i64, tpu.core_type = #tpu.core_type<tc>, window_params = [{transform_indices = @transform_0, window_bounds = array<i64: 2, 8, 24>}, {transform_indices = @transform_1, window_bounds = array<i64: 2, 8, 1>}, {transform_indices = @transform_2, window_bounds = array<i64: 2, 8, 1>}, {transform_indices = @transform_3, window_bounds = array<i64: 8, 32>}, {pipeline_mode = #tpu.pipeline_mode<synchronous>, transform_indices = @transform_4, window_bounds = array<i64: 5, 8>}, {transform_indices = @transform_5, window_bounds = array<i64: 2, 8, 32>}]} {
    %c0 = arith.constant 0 : index
    %c0_0 = arith.constant 0 : index
    %c0_1 = arith.constant 0 : index
    %0 = vector.load %arg1[%c0, %c0_0, %c0_1] : memref<2x8x24xf32, #tpu.memory_space<vmem>>, vector<2x8x24xf32>
    %c0_2 = arith.constant 0 : index
    %c0_3 = arith.constant 0 : index
    %c0_4 = arith.constant 0 : index
    %1 = vector.load %arg2[%c0_2, %c0_3, %c0_4] : memref<2x8x1xi32, #tpu.memory_space<vmem>>, vector<2x8x1xi32>
    %c0_5 = arith.constant 0 : index
    %c0_6 = arith.constant 0 : index
    %c0_7 = arith.constant 0 : index
    %2 = vector.load %arg3[%c0_5, %c0_6, %c0_7] : memref<2x8x1xi32, #tpu.memory_space<vmem>>, vector<2x8x1xi32>
    %c0_i32 = arith.constant 0 : i32
    %3 = vector.broadcast %c0_i32 : i32 to vector<2x8x1xi32>
    %4 = arith.cmpi ne, %2, %3 : vector<2x8x1xi32>
    %c0_8 = arith.constant 0 : index
    %c0_9 = arith.constant 0 : index
    %5 = vector.load %arg4[%c0_8, %c0_9] : memref<8x32xf32, #tpu.memory_space<vmem>>, vector<8x32xf32>
    %c0_10 = arith.constant 0 : index
    %c0_11 = arith.constant 0 : index
    %6 = vector.load %arg5[%c0_10, %c0_11] : memref<5x8xf32, #tpu.memory_space<vmem>>, vector<5x8xf32>
    %cst = arith.constant 0.000000e+00 : f32
    %7 = vector.broadcast %cst : f32 to vector<2x8x8xf32>
    %8 = vector.extract_strided_slice %6 {offsets = [0, 0], sizes = [1, 8], strides = [1, 1]} : vector<5x8xf32> to vector<1x8xf32>
    %9 = vector.shape_cast %8 : vector<1x8xf32> to vector<1x1x8xf32>
    %c0_i32_12 = arith.constant 0 : i32
    %10 = vector.broadcast %c0_i32_12 : i32 to vector<2x8x1xi32>
    %11 = arith.cmpi eq, %1, %10 : vector<2x8x1xi32>
    %cst_13 = arith.constant 0.000000e+00 : f32
    %12 = vector.shape_cast %11 : vector<2x8x1xi1> to vector<2x8x1xi1>
    %13 = vector.broadcast %12 : vector<2x8x1xi1> to vector<2x8x8xi1>
    %14 = vector.shape_cast %9 : vector<1x1x8xf32> to vector<1x1x8xf32>
    %15 = vector.broadcast %14 : vector<1x1x8xf32> to vector<2x8x8xf32>
    %16 = vector.broadcast %cst_13 : f32 to vector<2x8x8xf32>
    %17 = arith.select %13, %15, %16 : vector<2x8x8xi1>, vector<2x8x8xf32>
    %18 = arith.addf %7, %17 : vector<2x8x8xf32>
    %19 = vector.extract_strided_slice %6 {offsets = [1, 0], sizes = [1, 8], strides = [1, 1]} : vector<5x8xf32> to vector<1x8xf32>
    %20 = vector.shape_cast %19 : vector<1x8xf32> to vector<1x1x8xf32>
    %c1_i32 = arith.constant 1 : i32
    %21 = vector.broadcast %c1_i32 : i32 to vector<2x8x1xi32>
    %22 = arith.cmpi eq, %1, %21 : vector<2x8x1xi32>
    %cst_14 = arith.constant 0.000000e+00 : f32
    %23 = vector.shape_cast %22 : vector<2x8x1xi1> to vector<2x8x1xi1>
    %24 = vector.broadcast %23 : vector<2x8x1xi1> to vector<2x8x8xi1>
    %25 = vector.shape_cast %20 : vector<1x1x8xf32> to vector<1x1x8xf32>
    %26 = vector.broadcast %25 : vector<1x1x8xf32> to vector<2x8x8xf32>
    %27 = vector.broadcast %cst_14 : f32 to vector<2x8x8xf32>
    %28 = arith.select %24, %26, %27 : vector<2x8x8xi1>, vector<2x8x8xf32>
    %29 = arith.addf %18, %28 : vector<2x8x8xf32>
    %30 = vector.extract_strided_slice %6 {offsets = [2, 0], sizes = [1, 8], strides = [1, 1]} : vector<5x8xf32> to vector<1x8xf32>
    %31 = vector.shape_cast %30 : vector<1x8xf32> to vector<1x1x8xf32>
    %c2_i32 = arith.constant 2 : i32
    %32 = vector.broadcast %c2_i32 : i32 to vector<2x8x1xi32>
    %33 = arith.cmpi eq, %1, %32 : vector<2x8x1xi32>
    %cst_15 = arith.constant 0.000000e+00 : f32
    %34 = vector.shape_cast %33 : vector<2x8x1xi1> to vector<2x8x1xi1>
    %35 = vector.broadcast %34 : vector<2x8x1xi1> to vector<2x8x8xi1>
    %36 = vector.shape_cast %31 : vector<1x1x8xf32> to vector<1x1x8xf32>
    %37 = vector.broadcast %36 : vector<1x1x8xf32> to vector<2x8x8xf32>
    %38 = vector.broadcast %cst_15 : f32 to vector<2x8x8xf32>
    %39 = arith.select %35, %37, %38 : vector<2x8x8xi1>, vector<2x8x8xf32>
    %40 = arith.addf %29, %39 : vector<2x8x8xf32>
    %41 = vector.extract_strided_slice %6 {offsets = [3, 0], sizes = [1, 8], strides = [1, 1]} : vector<5x8xf32> to vector<1x8xf32>
    %42 = vector.shape_cast %41 : vector<1x8xf32> to vector<1x1x8xf32>
    %c3_i32 = arith.constant 3 : i32
    %43 = vector.broadcast %c3_i32 : i32 to vector<2x8x1xi32>
    %44 = arith.cmpi eq, %1, %43 : vector<2x8x1xi32>
    %cst_16 = arith.constant 0.000000e+00 : f32
    %45 = vector.shape_cast %44 : vector<2x8x1xi1> to vector<2x8x1xi1>
    %46 = vector.broadcast %45 : vector<2x8x1xi1> to vector<2x8x8xi1>
    %47 = vector.shape_cast %42 : vector<1x1x8xf32> to vector<1x1x8xf32>
    %48 = vector.broadcast %47 : vector<1x1x8xf32> to vector<2x8x8xf32>
    %49 = vector.broadcast %cst_16 : f32 to vector<2x8x8xf32>
    %50 = arith.select %46, %48, %49 : vector<2x8x8xi1>, vector<2x8x8xf32>
    %51 = arith.addf %40, %50 : vector<2x8x8xf32>
    %52 = vector.extract_strided_slice %6 {offsets = [4, 0], sizes = [1, 8], strides = [1, 1]} : vector<5x8xf32> to vector<1x8xf32>
    %53 = vector.shape_cast %52 : vector<1x8xf32> to vector<1x1x8xf32>
    %c4_i32 = arith.constant 4 : i32
    %54 = vector.broadcast %c4_i32 : i32 to vector<2x8x1xi32>
    %55 = arith.cmpi eq, %1, %54 : vector<2x8x1xi32>
    %cst_17 = arith.constant 0.000000e+00 : f32
    %56 = vector.shape_cast %55 : vector<2x8x1xi1> to vector<2x8x1xi1>
    %57 = vector.broadcast %56 : vector<2x8x1xi1> to vector<2x8x8xi1>
    %58 = vector.shape_cast %53 : vector<1x1x8xf32> to vector<1x1x8xf32>
    %59 = vector.broadcast %58 : vector<1x1x8xf32> to vector<2x8x8xf32>
    %60 = vector.broadcast %cst_17 : f32 to vector<2x8x8xf32>
    %61 = arith.select %57, %59, %60 : vector<2x8x8xi1>, vector<2x8x8xf32>
    %62 = arith.addf %51, %61 : vector<2x8x8xf32>
    %cst_18 = arith.constant 5.65685415 : f32
    %63 = vector.broadcast %cst_18 : f32 to vector<2x8x24xf32>
    %64 = arith.mulf %0, %63 : vector<2x8x24xf32>
    %65 = tpu.concatenate %64, %62 in 2 : vector<2x8x24xf32>, vector<2x8x8xf32> -> vector<2x8x32xf32>
    %66 = vector.shape_cast %5 : vector<8x32xf32> to vector<1x8x32xf32>
    %67 = vector.broadcast %66 : vector<1x8x32xf32> to vector<2x8x32xf32>
    %68 = arith.addf %65, %67 : vector<2x8x32xf32>
    %cst_19 = arith.constant 0.000000e+00 : f32
    %69 = vector.shape_cast %4 : vector<2x8x1xi1> to vector<2x8x1xi1>
    %70 = vector.broadcast %69 : vector<2x8x1xi1> to vector<2x8x32xi1>
    %71 = vector.broadcast %cst_19 : f32 to vector<2x8x32xf32>
    %72 = arith.select %70, %68, %71 : vector<2x8x32xi1>, vector<2x8x32xf32>
    %c0_20 = arith.constant 0 : index
    %c0_21 = arith.constant 0 : index
    %c0_22 = arith.constant 0 : index
    %73 = vector.load %arg6[%c0_20, %c0_21, %c0_22] : memref<2x8x32xf32, #tpu.memory_space<vmem>>, vector<2x8x32xf32>
    tpu.vector_store %arg6[%c0_20, %c0_21, %c0_22], %72 {strides = array<i32>} : memref<2x8x32xf32, #tpu.memory_space<vmem>>, vector<2x8x32xf32>,
    return
  }
  func.func @transform_0(%arg0: i32) -> (i32, i32, i32) {
    %c0_i32 = arith.constant 0 : i32
    %c0_i32_0 = arith.constant 0 : i32
    %c0_i32_1 = arith.constant 0 : i32
    return %c0_i32, %arg0, %c0_i32_0 : i32, i32, i32
  }
  func.func @transform_1(%arg0: i32) -> (i32, i32, i32) {
    %c0_i32 = arith.constant 0 : i32
    %c0_i32_0 = arith.constant 0 : i32
    %c0_i32_1 = arith.constant 0 : i32
    return %c0_i32, %arg0, %c0_i32_0 : i32, i32, i32
  }
  func.func @transform_2(%arg0: i32) -> (i32, i32, i32) {
    %c0_i32 = arith.constant 0 : i32
    %c0_i32_0 = arith.constant 0 : i32
    %c0_i32_1 = arith.constant 0 : i32
    return %c0_i32, %arg0, %c0_i32_0 : i32, i32, i32
  }
  func.func @transform_3(%arg0: i32) -> (i32, i32) {
    %c0_i32 = arith.constant 0 : i32
    %c0_i32_0 = arith.constant 0 : i32
    return %arg0, %c0_i32 : i32, i32
  }
  func.func @transform_4(%arg0: i32) -> (i32, i32) {
    %c0_i32 = arith.constant 0 : i32
    %c0_i32_0 = arith.constant 0 : i32
    %c0_i32_1 = arith.constant 0 : i32
    return %c0_i32, %c0_i32_0 : i32, i32
  }
  func.func @transform_5(%arg0: i32) -> (i32, i32, i32) {
    %c0_i32 = arith.constant 0 : i32
    %c0_i32_0 = arith.constant 0 : i32
    %c0_i32_1 = arith.constant 0 : i32
    return %c0_i32, %arg0, %c0_i32_0 : i32, i32, i32
  }
}

</mosaic_0001>

<bundles_post_ra>
// kernel: tpu_custom_call.1
= control target key start
LH: loop header
LB: loop body
LE: loop exit
PB: predicated region body
PF: predicated region fallthrough
CT: control target
= control target key end

     0   :  { %v208_v2 = vmov 0   ;;  %s279_s0 = inlined_call_operand.vmem [shape: f32[2,8,24], index: 0, kind: input, shape index: {}]   ;;  %s280_s1 = inlined_call_operand.vmem [shape: s32[2,8,1], index: 1, kind: input, shape index: {}]   ;;  %s281_s2 = inlined_call_operand.vmem [shape: s32[2,8,1], index: 2, kind: input, shape index: {}]   ;;  %s282_s3 = inlined_call_operand.vmem [shape: f32[8,32], index: 3, kind: input, shape index: {}]   ;;  %s283_s4 = inlined_call_operand.vmem [shape: f32[5,8], index: 4, kind: input, shape index: {}]   ;;  %s284_s5 = inlined_call_operand.hbm [shape: f32[2,8,32], index: 5, kind: output, shape index: {}]  }
   0x1   :  { %v23_v0 = vld [vmem:[%s280_s1] sm:$0xff]  ;;  %v24_v1 = vld [vmem:[%s280_s1 + $0x8] sm:$0xff]  ;;  %183 = vset.pattern.permute.xlu1 %v208_v2  ;;  %182 = vset.pattern.permute.xlu0 %v208_v2 }
   0x2   :  { %vm51_vm0 = vcmp.eq.s32.totalorder %v23_v0, 1  ;;  %vm31_vm1 = vcmp.eq.s32.totalorder %v23_v0, 0  ;;  %vm52_vm2 = vcmp.eq.s32.totalorder %v24_v1, 1  ;;  %vm32_vm3 = vcmp.eq.s32.totalorder %v24_v1, 0 }
   0x3   :  { %v53_v3 = vsel %vm51_vm0, 1, %v208_v2  ;;  %v33_v4 = vsel %vm31_vm1, 1, %v208_v2 }
   0x4   :  { %56 = vperm.xlu1 %183, %v53_v3   ;;  %36 = vperm.xlu0 %182, %v33_v4  }
   0x5   :  { %10 = vsyncpa [#allocation3], 0  ;;  %v54_v5 = vsel %vm52_vm2, 1, %v208_v2  ;;  %v34_v6 = vsel %vm32_vm3, 1, %v208_v2  ;;  %vm72_vm4 = vcmp.eq.s32.totalorder %v24_v1, 2  ;;  %vm71_vm5 = vcmp.eq.s32.totalorder %v23_v0, 2 }
   0x6   :  { %v74_v7 = vsel %vm72_vm4, 1, %v208_v2  ;;  %v73_v8 = vsel %vm71_vm5, 1, %v208_v2  ;;  %vm92_vm6 = vcmp.eq.s32.totalorder %v24_v1, 3  ;;  %vm91_vm7 = vcmp.eq.s32.totalorder %v23_v0, 3  ;;  %v26_v11 = vld [vmem:[%s281_s2 + $0x8] sm:$0xff]  ;;  %v25_v12 = vld [vmem:[%s281_s2] sm:$0xff] }
   0x7   :  { %v94_v9 = vsel %vm92_vm6, 1, %v208_v2  ;;  %v93_v10 = vsel %vm91_vm7, 1, %v208_v2  ;;  %vm112_vm8 = vcmp.eq.s32.totalorder %v24_v1, 4  ;;  %vm111_vm9 = vcmp.eq.s32.totalorder %v23_v0, 4  ;;  %v30_v23 = vld [vmem:[%s283_s4] sm:$0x1f] }
   0x8   :  { %59 = vperm.xlu1 %183, %v54_v5   ;;  %39 = vperm.xlu0 %182, %v34_v6   ;;  %v114_v13 = vsel %vm112_vm8, 1, %v208_v2  ;;  %v113_v14 = vsel %vm111_vm9, 1, %v208_v2  ;;  %vm28_vm10 = vcmp.ne.s32.totalorder %v26_v11, 0  ;;  %vm27_vm11 = vcmp.ne.s32.totalorder %v25_v12, 0  ;;  %s209_s4 = smov 24   ;;  %v22_v58 = vld [vmem:[%s279_s0 + $0x8] sm:$0xff] }
   0x9   :  { %v147_v15 = vsel %vm28_vm10, 1, %v208_v2  ;;  %v146_v16 = vsel %vm27_vm11, 1, %v208_v2  ;;  %v43_v17 = vlaneseq  ;;  %v21_v59 = vld [vmem:[%s279_s0] sm:$0xff]  ;;  %v132_v62 = vmul.f32 5.656854, %v22_v58  ;;  %s210_s7 = smov [#allocation2]  }
   0xa   :  { %v131_v63 = vmul.f32 5.656854, %v21_v59  ;;  %vm141_vm6 = vcmask 195584   ;;  %v29_v0 = vld [vmem:[%s282_s3] sm:$0xff]  ;;  %s166_s8 = sshll.u32 %s210_s7, 4  ;;  %vm158_vm7 = vcmask 261120   ;;  %s167_s8 = int_to_ptr.vmem [resolvable:$true] %s166_s8 }
   0xb   :  { %v44_v18 = vshrl.u32 %v43_v17, 7  ;;  %s184_s0 = scalar_lea.vmem %s167_s8, 256  ;;  %p189_p1 = scmp.lt.s32.totalorder %s167_s8, %s167_s8 }
   0xc   :  { %79 = vperm.xlu1 %183, %v74_v7   ;;  %76 = vperm.xlu0 %182, %v73_v8   ;;  %p185_p0 = scmp.ne.s32.totalorder %s167_s8, %s184_s0  ;;  %p190_p2 = scmp.lt.s32.totalorder %s184_s0, %s184_s0 }
   0xd   :  { %v65_v21 = vsub.s32 1, %v44_v18  ;;  %v45_v22 = vsub.s32 0, %v44_v18  ;;  %v85_v26 = vsub.s32 2, %v44_v18  ;;  %v105_v27 = vsub.s32 3, %v44_v18 }
   0xe   :  { %v125_v34 = vsub.s32 4, %v44_v18  ;;  %p191_p3 = por %p190_p2, %p189_p1 }
   0xf   :  { %v66_v28 = vrot.slane %v30_v23, %v65_v21  ;;  %v46_v29 = vrot.slane %v30_v23, %v45_v22  ;;  %v86_v30 = vrot.slane %v30_v23, %v85_v26  ;;  %v106_v33 = vrot.slane %v30_v23, %v105_v27 }
  0x10   :  { %99 = vperm.xlu1 %183, %v94_v9   ;;  %96 = vperm.xlu0 %182, %v93_v10   ;;  %v126_v47 = vrot.slane %v30_v23, %v125_v34  ;;  %p192_p4 = pnand %p191_p3, %p185_p0 }
  0x14   :  { %119 = vperm.xlu1 %183, %v114_v13   ;;  %116 = vperm.xlu0 %182, %v113_v14  }
  0x18   :  { %152 = vperm.xlu1 %183, %v147_v15   ;;  %149 = vperm.xlu0 %182, %v146_v16  }
  0x83   :  { %v57_v19 = vpop.permute.xlu1 %56  ;;  %v37_v20 = vpop.permute.xlu0 %36 }
  0x84   :  { %vm61_vm12 = vcmp.eq.s32.totalorder %v57_v19, 1  ;;  %vm41_vm13 = vcmp.eq.s32.totalorder %v37_v20, 1 }
  0x85   :  { %v67_v35 = vsel %vm61_vm12, %v66_v28, 0.0  ;;  %v47_v36 = vsel %vm41_vm13, %v46_v29, 0.0 }
  0x86   :  { %v69_v43 = vadd.f32 %v67_v35, %v47_v36 }
  0x87   :  { %v60_v24 = vpop.permute.xlu1 %59  ;;  %v40_v25 = vpop.permute.xlu0 %39 }
  0x88   :  { %vm62_vm14 = vcmp.eq.s32.totalorder %v60_v24, 1  ;;  %vm42_vm15 = vcmp.eq.s32.totalorder %v40_v25, 1 }
  0x89   :  { %v68_v37 = vsel %vm62_vm14, %v66_v28, 0.0  ;;  %v48_v38 = vsel %vm42_vm15, %v46_v29, 0.0 }
  0x8a   :  { %v70_v44 = vadd.f32 %v68_v37, %v48_v38 }
  0x8b   :  { %v80_v31 = vpop.permute.xlu1 %79  ;;  %v77_v32 = vpop.permute.xlu0 %76 }
  0x8c   :  { %vm82_vm0 = vcmp.eq.s32.totalorder %v80_v31, 1  ;;  %vm81_vm1 = vcmp.eq.s32.totalorder %v77_v32, 1 }
  0x8d   :  { %v88_v39 = vsel %vm82_vm0, %v86_v30, 0.0  ;;  %v87_v40 = vsel %vm81_vm1, %v86_v30, 0.0 }
  0x8e   :  { %v90_v48 = vadd.f32 %v88_v39, %v70_v44  ;;  %v89_v49 = vadd.f32 %v87_v40, %v69_v43 }
  0x8f   :  { %v100_v41 = vpop.permute.xlu1 %99  ;;  %v97_v42 = vpop.permute.xlu0 %96 }
  0x90   :  { %vm102_vm2 = vcmp.eq.s32.totalorder %v100_v41, 1  ;;  %vm101_vm3 = vcmp.eq.s32.totalorder %v97_v42, 1 }
  0x91   :  { %v108_v45 = vsel %vm102_vm2, %v106_v33, 0.0  ;;  %v107_v46 = vsel %vm101_vm3, %v106_v33, 0.0 }
  0x92   :  { %v110_v52 = vadd.f32 %v108_v45, %v90_v48  ;;  %v109_v53 = vadd.f32 %v107_v46, %v89_v49 }
  0x93   :  { %v120_v50 = vpop.permute.xlu1 %119  ;;  %v117_v51 = vpop.permute.xlu0 %116 }
  0x94   :  { %vm122_vm4 = vcmp.eq.s32.totalorder %v120_v50, 1  ;;  %vm121_vm5 = vcmp.eq.s32.totalorder %v117_v51, 1 }
  0x95   :  { %v128_v54 = vsel %vm122_vm4, %v126_v47, 0.0  ;;  %v127_v55 = vsel %vm121_vm5, %v126_v47, 0.0 }
  0x96   :  { %v130_v56 = vadd.f32 %v128_v54, %v110_v52  ;;  %v129_v57 = vadd.f32 %v127_v55, %v109_v53 }
  0x97   :  { %v153_v60 = vpop.permute.xlu1 %152  ;;  %v150_v61 = vpop.permute.xlu0 %149 }
  0x98   :  { %137 = vrot.lane.b32.xlu1 %v130_v56, %s209_s4  ;;  %135 = vrot.lane.b32.xlu0 %v129_v57, %s209_s4  ;;  %vm155_vm8 = vcmp.eq.s32.totalorder %v153_v60, 1  ;;  %vm154_vm9 = vcmp.eq.s32.totalorder %v150_v61, 1 }
 0x10a   :  { %v138_v1 = vpop.permute.xlu1 %137  ;;  %v136_v2 = vpop.permute.xlu0 %135 }
 0x10b   :  { %v143_v3 = vsel %vm141_vm6, %v132_v62, %v138_v1  ;;  %v142_v4 = vsel %vm141_vm6, %v131_v63, %v136_v2 }
 0x10c   :  { %v145_v5 = vadd.f32 %v143_v3, %v29_v0  ;;  %v144_v6 = vadd.f32 %v142_v4, %v29_v0 }
 0x10e   :  { %v157_v7 = vsel %vm155_vm8, %v145_v5, 0.0  ;;  %v156_v8 = vsel %vm154_vm9, %v144_v6, 0.0 }
 0x10f   :  { %160 = vst.msk [vmem:[#allocation2 + $0x8] sm:$0xff] %vm158_vm7, %v157_v7  ;;  %159 = vst.msk [vmem:[#allocation2] sm:$0xff] %vm158_vm7, %v156_v8 }
 0x110   :  { %195 = shalt.err (!%p192_p4)
}
 0x111   :  { %s196_s10 = scalar_lea.hbm %s284_s5, 256 }
 0x112   :  { %p197_p5 = scmp.ne.s32.totalorder %s284_s5, %s196_s10  ;;  %p200_p6 = scmp.lt.u32.totalorder %s196_s10, %s284_s5 }
 0x114   :  { %p202_p7 = pnand %p200_p6, %p197_p5 }
 0x116   :  { %205 = shalt.err (!%p202_p7)
}
 0x117   :  { %s211_s15 = smov 128   ;;  %s212_s16 = smov 8  }
 0x118   :  { %172 = dma.vmem_to_hbm [thread:$0]  %s167_s8, 256, %s284_s5, [#allocation3], %s211_s15, %s211_s15, %s212_s16  }
 0x119   :  { %206 = dma.done.wait [#allocation3], 256  }
 0x11a   :  { %207 = vsyncadd [#allocation3], 4294967040 }
 0x11b   :  { %176 = vsyncpa [#allocation3], 1 }

</bundles_post_ra>
